<compile_context>
chip_gen: v7x
topology: tpu7x:2x2x1
jax: 0.10.0
libtpu: 0.0.40
codegen_flags: <defaults>
</compile_context>

<pallas_src>
import jax
import jax.numpy as jnp
from jax.experimental import pallas as pl
from jax.experimental.pallas import tpu as pltpu

EMBEDDING_DIM = 50
IMAGE_SIZE = 28 * 28               # 784
NUM_CLASSES = 10
NUM_CLASSES_PAD = 16               # one-hot columns padded for clean tiling
K1 = IMAGE_SIZE + NUM_CLASSES_PAD  # 800 = fused layer-1 contraction dim
H1, H2, OUT = 512, 256, 1


def _round_up(x, m):
    return (x + m - 1) // m * m


def _disc_kernel(x_ref, w1_ref, b1_ref, w2_ref, b2_ref, w3_ref, b3_ref, o_ref):
    """One batch tile: x = [img | onehot16] (TB, 800) bf16 -> score (TB, 1) f32."""
    # --- Layer 1 (embedding already folded into w1's last 16 rows) -----------
    h1 = jnp.dot(x_ref[...], w1_ref[...], preferred_element_type=jnp.float32)
    h1 = h1 + b1_ref[...]                           # (TB,512) + (1,512)
    h1 = jnp.where(h1 >= 0.0, h1, 0.2 * h1)         # LeakyReLU(0.2)

    # --- Layer 2 ---------------------------------------------------------------
    h2 = jnp.dot(h1.astype(jnp.bfloat16), w2_ref[...],
                 preferred_element_type=jnp.float32)
    h2 = h2 + b2_ref[...]                           # (TB,256) + (1,256)
    h2 = jnp.where(h2 >= 0.0, h2, 0.2 * h2)         # LeakyReLU(0.2)

    # --- Layer 3: 256 -> 1 as VPU multiply + XLU lane reduction (skip N=1 MXU)
    h3 = jnp.sum(h2 * w3_ref[...], axis=-1, keepdims=True) + b3_ref[0, 0]

    # --- Numerically-stable sigmoid; exact recip keeps output strictly in (0,1)
    ez = jnp.exp(-jnp.abs(h3))
    inv = 1.0 / (1.0 + ez)
    o_ref[...] = jnp.where(h3 >= 0.0, inv, ez * inv)


def fold_params(params):
    """One-time prep: fold Embedding into Linear-1 and cast MXU weights to bf16."""
    emb_proj = jnp.dot(params["embed"], params["w1_emb"])           # (10, 512) f32
    emb_proj = jnp.pad(emb_proj, ((0, NUM_CLASSES_PAD - NUM_CLASSES), (0, 0)))
    w1 = jnp.concatenate([params["w1_img"], emb_proj], axis=0)      # (800, 512)
    return {
        "w1": w1.astype(jnp.bfloat16),              # (800, 512) bf16
        "b1": params["b1"],                          # (1, 512)  f32
        "w2": params["w2"].astype(jnp.bfloat16),     # (512, 256) bf16
        "b2": params["b2"],                          # (1, 256)  f32
        "w3": params["w3"],                          # (1, 256)  f32
        "b3": params["b3"],                          # (1, 1)    f32
    }


def discriminator_forward(img, labels, folded):
    """img: (B,1,28,28) f32 (NCHW), labels: (B,) int -> (B,1) f32 in (0,1)."""
    B = img.shape[0]

    # Batch tiling: big tiles amortize per-grid-step overhead; force >= 2 tiles
    # whenever possible so "parallel" shards across both TensorCores on v7x.
    TB = min(1024, _round_up(B, 8))
    if B >= 16 and _round_up(B, TB) // TB < 2:
        TB = _round_up(pl.cdiv(B, 2), 8)
    B_pad = _round_up(B, TB)

    # Single fused wrapper pass: flatten + one-hot concat + bf16 cast (+ batch pad).
    img_flat = img.reshape(B, IMAGE_SIZE)
    onehot = (labels.astype(jnp.int32)[:, None] ==
              jnp.arange(NUM_CLASSES_PAD, dtype=jnp.int32)[None, :])
    x = jnp.concatenate([img_flat, onehot.astype(img_flat.dtype)],
                        axis=1).astype(jnp.bfloat16)                 # (B, 800)
    if B_pad != B:
        x = jnp.pad(x, ((0, B_pad - B), (0, 0)))

    # Weights/biases never change block index -> single-buffer them (stay
    # VMEM-resident across batch tiles, no wasted double-buffer / warm-up DMA).
    def _const(shape):
        return pl.BlockSpec(shape, lambda i: (0, 0), pipeline_mode=pl.Buffered(1))

    out = pl.pallas_call(
        _disc_kernel,
        out_shape=jax.ShapeDtypeStruct((B_pad, OUT), jnp.float32),
        grid=(B_pad // TB,),
        in_specs=[
            pl.BlockSpec((TB, K1), lambda i: (i, 0)),                # x tile
            _const((K1, H1)),                                        # fused w1
            _const((1, H1)),                                         # b1
            _const((H1, H2)),                                        # w2
            _const((1, H2)),                                         # b2
            _const((1, H2)),                                         # w3 row
            pl.BlockSpec(memory_space=pltpu.MemorySpace.SMEM),       # b3 scalar
        ],
        out_specs=pl.BlockSpec((TB, OUT), lambda i: (i, 0)),
        compiler_params=pltpu.CompilerParams(
            dimension_semantics=("parallel",),
            vmem_limit_bytes=32 * 1024 * 1024),
    )(x, folded["w1"], folded["b1"], folded["w2"], folded["b2"],
      folded["w3"], folded["b3"])

    return out[:B]


def _reference_forward(img, labels, params):
    """Pure-JAX f32 reference matching the PyTorch module exactly."""
    B = img.shape[0]
    img_flat = img.reshape(B, -1)
    emb = jnp.take(params["embed"], labels, axis=0)
    x = jnp.concatenate([img_flat, emb], axis=1)                    # (B, 834)
    w1 = jnp.concatenate([params["w1_img"], params["w1_emb"]], axis=0)
    h1 = x @ w1 + params["b1"]
    h1 = jnp.where(h1 >= 0, h1, 0.2 * h1)
    h2 = h1 @ params["w2"] + params["b2"]
    h2 = jnp.where(h2 >= 0, h2, 0.2 * h2)
    h3 = h2 @ params["w3"].T + params["b3"]
    return jax.nn.sigmoid(h3)


def init_params(key):
    """Deterministic synthetic parameters (f32 master copies, PyTorch shapes)."""
    ks = jax.random.split(key, 8)
    scale = 0.02
    return {
        # nn.Embedding(10, 50)
        "embed": scale * jax.random.normal(ks[0], (NUM_CLASSES, EMBEDDING_DIM),
                                           jnp.float32),
        # nn.Linear(834, 512) stored as (in, out), split into image / embed rows
        "w1_img": scale * jax.random.normal(ks[1], (IMAGE_SIZE, H1), jnp.float32),
        "w1_emb": scale * jax.random.normal(ks[2], (EMBEDDING_DIM, H1),
                                            jnp.float32),
        "b1": scale * jax.random.normal(ks[3], (1, H1), jnp.float32),
        # nn.Linear(512, 256)
        "w2": scale * jax.random.normal(ks[4], (H1, H2), jnp.float32),
        "b2": scale * jax.random.normal(ks[5], (1, H2), jnp.float32),
        # nn.Linear(256, 1): weight stored as its (1, 256) row
        "w3": scale * jax.random.normal(ks[6], (OUT, H2), jnp.float32),
        "b3": scale * jax.random.normal(ks[7], (1, OUT), jnp.float32),
    }


if __name__ == "__main__":
    key = jax.random.PRNGKey(0)
    k_img, k_lbl, k_par = jax.random.split(key, 3)

    # B=19 exercises batch padding AND the forced 2-tile (v7x megacore) path.
    B = 19
    img = jax.random.normal(k_img, (B, 1, 28, 28), jnp.float32)      # NCHW
    labels = jax.random.randint(k_lbl, (B,), 0, NUM_CLASSES, jnp.int32)
    params = init_params(k_par)
    folded = fold_params(params)                                     # fold once

    fwd = jax.jit(discriminator_forward)   # fuses the concat/cast/pad pass
    out = jax.block_until_ready(fwd(img, labels, folded))

    # Sanity: shape (B,1), open-interval sigmoid range, close to f32 reference
    # (tolerance covers the bf16 weights / activations).
    assert out.shape == (B, OUT)
    assert bool(jnp.all(jnp.isfinite(out)))
    assert bool(jnp.all((out > 0.0) & (out < 1.0)))
    ref = _reference_forward(img, labels, params)
    max_err = float(jnp.max(jnp.abs(out - ref)))
    assert max_err < 3e-2, f"mismatch vs reference: {max_err}"

    print("KERNEL_OK")
</pallas_src>

<mosaic_0001>
module attributes {stable_mosaic.version = 11 : i64} {
  func.func @_disc_kernel(%arg0: i32, %arg1: memref<16x800xbf16, #tpu.memory_space<vmem>>, %arg2: memref<800x512xbf16, #tpu.memory_space<vmem>>, %arg3: memref<1x512xf32, #tpu.memory_space<vmem>>, %arg4: memref<512x256xbf16, #tpu.memory_space<vmem>>, %arg5: memref<1x256xf32, #tpu.memory_space<vmem>>, %arg6: memref<1x256xf32, #tpu.memory_space<vmem>>, %arg7: memref<1x1xf32, #tpu.memory_space<smem>>, %arg8: memref<16x1xf32, #tpu.memory_space<vmem>>) attributes {dimension_semantics = [#tpu.dimension_semantics<parallel>], iteration_bounds = array<i64: 2>, scalar_prefetch = 0 : i64, scratch_operands = 0 : i64, tpu.core_type = #tpu.core_type<tc>, window_params = [{transform_indices = @transform_0, window_bounds = array<i64: 16, 800>}, {pipeline_mode = #tpu.pipeline_mode<synchronous>, transform_indices = @transform_1, window_bounds = array<i64: 800, 512>}, {pipeline_mode = #tpu.pipeline_mode<synchronous>, transform_indices = @transform_2, window_bounds = array<i64: 1, 512>}, {pipeline_mode = #tpu.pipeline_mode<synchronous>, transform_indices = @transform_3, window_bounds = array<i64: 512, 256>}, {pipeline_mode = #tpu.pipeline_mode<synchronous>, transform_indices = @transform_4, window_bounds = array<i64: 1, 256>}, {pipeline_mode = #tpu.pipeline_mode<synchronous>, transform_indices = @transform_5, window_bounds = array<i64: 1, 256>}, {transform_indices = @transform_6, window_bounds = array<i64: 1, 1>}, {transform_indices = @transform_7, window_bounds = array<i64: 16, 1>}]} {
    %c0 = arith.constant 0 : index
    %c0_0 = arith.constant 0 : index
    %0 = vector.load %arg1[%c0, %c0_0] : memref<16x800xbf16, #tpu.memory_space<vmem>>, vector<16x800xbf16>
    %c0_1 = arith.constant 0 : index
    %c0_2 = arith.constant 0 : index
    %1 = vector.load %arg2[%c0_1, %c0_2] : memref<800x512xbf16, #tpu.memory_space<vmem>>, vector<800x512xbf16>
    %cst = arith.constant dense<0.000000e+00> : vector<16x512xf32>
    %2 = tpu.matmul %0, %1, %cst {dimension_numbers = #tpu.dot_dimension_numbers<[1], [0], [0], [1], [0, 0, 1, 1], [], []>} : vector<16x800xbf16>, vector<800x512xbf16>, vector<16x512xf32> -> vector<16x512xf32>
    %c0_3 = arith.constant 0 : index
    %c0_4 = arith.constant 0 : index
    %3 = vector.load %arg3[%c0_3, %c0_4] : memref<1x512xf32, #tpu.memory_space<vmem>>, vector<1x512xf32>
    %4 = vector.broadcast %3 : vector<1x512xf32> to vector<16x512xf32>
    %5 = arith.addf %2, %4 : vector<16x512xf32>
    %cst_5 = arith.constant 0.000000e+00 : f32
    %6 = vector.broadcast %cst_5 : f32 to vector<16x512xf32>
    %7 = arith.cmpf oge, %5, %6 : vector<16x512xf32>
    %cst_6 = arith.constant 2.000000e-01 : f32
    %8 = vector.broadcast %cst_6 : f32 to vector<16x512xf32>
    %9 = arith.mulf %8, %5 : vector<16x512xf32>
    %10 = arith.select %7, %5, %9 : vector<16x512xi1>, vector<16x512xf32>
    %11 = arith.truncf %10 : vector<16x512xf32> to vector<16x512xbf16>
    %c0_7 = arith.constant 0 : index
    %c0_8 = arith.constant 0 : index
    %12 = vector.load %arg4[%c0_7, %c0_8] : memref<512x256xbf16, #tpu.memory_space<vmem>>, vector<512x256xbf16>
    %cst_9 = arith.constant dense<0.000000e+00> : vector<16x256xf32>
    %13 = tpu.matmul %11, %12, %cst_9 {dimension_numbers = #tpu.dot_dimension_numbers<[1], [0], [0], [1], [0, 0, 1, 1], [], []>} : vector<16x512xbf16>, vector<512x256xbf16>, vector<16x256xf32> -> vector<16x256xf32>
    %c0_10 = arith.constant 0 : index
    %c0_11 = arith.constant 0 : index
    %14 = vector.load %arg5[%c0_10, %c0_11] : memref<1x256xf32, #tpu.memory_space<vmem>>, vector<1x256xf32>
    %15 = vector.broadcast %14 : vector<1x256xf32> to vector<16x256xf32>
    %16 = arith.addf %13, %15 : vector<16x256xf32>
    %cst_12 = arith.constant 0.000000e+00 : f32
    %17 = vector.broadcast %cst_12 : f32 to vector<16x256xf32>
    %18 = arith.cmpf oge, %16, %17 : vector<16x256xf32>
    %cst_13 = arith.constant 2.000000e-01 : f32
    %19 = vector.broadcast %cst_13 : f32 to vector<16x256xf32>
    %20 = arith.mulf %19, %16 : vector<16x256xf32>
    %21 = arith.select %18, %16, %20 : vector<16x256xi1>, vector<16x256xf32>
    %c0_14 = arith.constant 0 : index
    %c0_15 = arith.constant 0 : index
    %22 = vector.load %arg6[%c0_14, %c0_15] : memref<1x256xf32, #tpu.memory_space<vmem>>, vector<1x256xf32>
    %23 = vector.broadcast %22 : vector<1x256xf32> to vector<16x256xf32>
    %24 = arith.mulf %21, %23 : vector<16x256xf32>
    %cst_16 = arith.constant dense<0.000000e+00> : vector<16xf32>
    %25 = vector.multi_reduction <add>, %24, %cst_16 [1] : vector<16x256xf32> to vector<16xf32>
    %26 = vector.shape_cast %25 : vector<16xf32> to vector<16x1xf32>
    %c0_17 = arith.constant 0 : index
    %c0_18 = arith.constant 0 : index
    %27 = memref.load %arg7[%c0_17, %c0_18] : memref<1x1xf32, #tpu.memory_space<smem>>
    %28 = vector.broadcast %27 : f32 to vector<16x1xf32>
    %29 = arith.addf %26, %28 : vector<16x1xf32>
    %30 = math.absf %29 : vector<16x1xf32>
    %cst_19 = arith.constant 0.000000e+00 : f32
    %31 = vector.broadcast %cst_19 : f32 to vector<16x1xf32>
    %32 = arith.subf %31, %30 : vector<16x1xf32>
    %33 = math.exp %32 : vector<16x1xf32>
    %cst_20 = arith.constant 1.000000e+00 : f32
    %34 = vector.broadcast %cst_20 : f32 to vector<16x1xf32>
    %35 = arith.addf %34, %33 : vector<16x1xf32>
    %cst_21 = arith.constant 1.000000e+00 : f32
    %36 = vector.broadcast %cst_21 : f32 to vector<16x1xf32>
    %37 = arith.divf %36, %35 : vector<16x1xf32>
    %cst_22 = arith.constant 0.000000e+00 : f32
    %38 = vector.broadcast %cst_22 : f32 to vector<16x1xf32>
    %39 = arith.cmpf oge, %29, %38 : vector<16x1xf32>
    %40 = arith.mulf %33, %37 : vector<16x1xf32>
    %41 = arith.select %39, %37, %40 : vector<16x1xi1>, vector<16x1xf32>
    %c0_23 = arith.constant 0 : index
    %c0_24 = arith.constant 0 : index
    %42 = vector.load %arg8[%c0_23, %c0_24] : memref<16x1xf32, #tpu.memory_space<vmem>>, vector<16x1xf32>
    tpu.vector_store %arg8[%c0_23, %c0_24], %41 {strides = array<i32>} : memref<16x1xf32, #tpu.memory_space<vmem>>, vector<16x1xf32>,
    return
  }
  func.func @transform_0(%arg0: i32) -> (i32, i32) {
    %c0_i32 = arith.constant 0 : i32
    %c0_i32_0 = arith.constant 0 : i32
    return %arg0, %c0_i32 : i32, i32
  }
  func.func @transform_1(%arg0: i32) -> (i32, i32) {
    %c0_i32 = arith.constant 0 : i32
    %c0_i32_0 = arith.constant 0 : i32
    %c0_i32_1 = arith.constant 0 : i32
    return %c0_i32, %c0_i32_0 : i32, i32
  }
  func.func @transform_2(%arg0: i32) -> (i32, i32) {
    %c0_i32 = arith.constant 0 : i32
    %c0_i32_0 = arith.constant 0 : i32
    %c0_i32_1 = arith.constant 0 : i32
    return %c0_i32, %c0_i32_0 : i32, i32
  }
  func.func @transform_3(%arg0: i32) -> (i32, i32) {
    %c0_i32 = arith.constant 0 : i32
    %c0_i32_0 = arith.constant 0 : i32
    %c0_i32_1 = arith.constant 0 : i32
    return %c0_i32, %c0_i32_0 : i32, i32
  }
  func.func @transform_4(%arg0: i32) -> (i32, i32) {
    %c0_i32 = arith.constant 0 : i32
    %c0_i32_0 = arith.constant 0 : i32
    %c0_i32_1 = arith.constant 0 : i32
    return %c0_i32, %c0_i32_0 : i32, i32
  }
  func.func @transform_5(%arg0: i32) -> (i32, i32) {
    %c0_i32 = arith.constant 0 : i32
    %c0_i32_0 = arith.constant 0 : i32
    %c0_i32_1 = arith.constant 0 : i32
    return %c0_i32, %c0_i32_0 : i32, i32
  }
  func.func @transform_6(%arg0: i32) -> (i32, i32) {
    %c0_i32 = arith.constant 0 : i32
    %c0_i32_0 = arith.constant 0 : i32
    %c0_i32_1 = arith.constant 0 : i32
    return %c0_i32, %c0_i32_0 : i32, i32
  }
  func.func @transform_7(%arg0: i32) -> (i32, i32) {
    %c0_i32 = arith.constant 0 : i32
    %c0_i32_0 = arith.constant 0 : i32
    return %arg0, %c0_i32 : i32, i32
  }
}

</mosaic_0001>

<bundles_post_ra>
// kernel: discriminator_forward.1
= control target key start
LH: loop header
LB: loop body
LE: loop exit
PB: predicated region body
PF: predicated region fallthrough
CT: control target
= control target key end

     0   :  { %s3727_s0 = inlined_call_operand.vmem [shape: bf16[32,800], index: 0, kind: input, shape index: {}]   ;;  %s3728_s1 = inlined_call_operand.hbm [shape: bf16[800,512], index: 1, kind: input, shape index: {}]   ;;  %s3729_s2 = inlined_call_operand.vmem [shape: f32[1,512], index: 2, kind: input, shape index: {}]   ;;  %s3730_s3 = inlined_call_operand.vmem [shape: bf16[512,256], index: 3, kind: input, shape index: {}]   ;;  %s3731_s4 = inlined_call_operand.vmem [shape: f32[1,256], index: 4, kind: input, shape index: {}]   ;;  %s3732_s5 = inlined_call_operand.vmem [shape: f32[1,256], index: 5, kind: input, shape index: {}]   ;;  %s3733_s6 = inlined_call_operand.<no memory space> [shape: f32[1,1], index: 6, kind: input, shape index: {}]   ;;  %s3734_s7 = inlined_call_operand.vmem [shape: f32[32,1], index: 7, kind: output, shape index: {}]  }
   0x1   :  { %12 = sst [smem:[#allocation2]] %s3733_s6 }
   0x2   :  { %13 = vsyncpa [#allocation4], 0  ;;  %s3404_s26 = smov 0  }
   0x3 LB: > { %s2554_s27 = sadd.s32 4294967295, %s3355_s26   ;;  %p2556_p0 = scmp.ge.s32.totalorder %s3355_s26, 1  ;;  %s3355_s26 = sphi %s3404_s26, %s19_s26  }
   0x4   : > { %p202_p1 = scmp.lt.s32.totalorder %s3355_s26, 3  ;;  %s3357_s28 = smov [#allocation3]  }
   0x5   : > { %s214_s29 = sshll.u32 %s3357_s28, 4  ;;  %p3418_p3 = scmp.eq.s32.totalorder %s2554_s27, 0  ;;  %s215_s29 = int_to_ptr.vmem [resolvable:$true] %s214_s29 }
   0x6   : > { %p3412_p2 = pnand %p2556_p0, %p202_p1  ;;  %s3317_s11 = scalar_lea.hbm %s3728_s1, 25600 }
   0x7   : > { %s3739_s6 = scalar_select %p3418_p3, 1, 0 }
   0x8   : > { %s3738_s30 = scalar_select %p3412_p2, 1, 0 }
   0x9   : > { %p2885_p4 = pneg %p3412_p2  ;;  %p3318_p6 = scmp.ne.s32.totalorder %s3728_s1, %s3317_s11 }
   0xa   : > { %p3324_p10 = scmp.lt.u32.totalorder %s3317_s11, %s3728_s1 }
   0xb   : > { %p3426_p5 = pnand %p3418_p3, %p2885_p4 }
   0xd   : > { %p3319_p7 = pneg %p3426_p5 }
   0xf   : > { %p3320_p8 = pnand %p3319_p7, %p3318_p6 }
  0x11   : > { %p3321_p9 = pneg %p3320_p8 }
  0x13   : > { %p3326_p11 = pnand %p3324_p10, %p3321_p9 }
  0x15   : > { %3329 = shalt.err (!%p3326_p11)
}
  0x16   : > { %s3330_s16 = scalar_lea.vmem %s215_s29, 25600  ;;  %p3338_p1 = scmp.lt.s32.totalorder %s215_s29, %s215_s29 }
  0x17   : > { %p3331_p12 = scmp.ne.s32.totalorder %s215_s29, %s3330_s16  ;;  %p3339_p4 = scmp.lt.s32.totalorder %s3330_s16, %s3330_s16 }
  0x19   : > { %p3333_p13 = pnand %p3331_p12, %p3319_p7  ;;  %p3340_p3 = por %p3339_p4, %p3338_p1 }
  0x1b   : > { %p3334_p0 = pneg %p3333_p13 }
  0x1d   : > { %p3341_p2 = pnand %p3340_p3, %p3334_p0 }
  0x1f   : > { %3344 = shalt.err (!%p3341_p2)
}
  0x20   : > { %s3358_s17 = smov 256   ;;  %s3359_s18 = smov 16  }
  0x21   : > { %2888 = dma.hbm_to_vmem [thread:$0]  (!%p3426_p5), %s3728_s1, 25600, %s215_s29, [#allocation4], %s3358_s17, %s3358_s17, %s3359_s18  }
  0x22   : > { %p3741_p6 = scmp.ne.s32.totalorder %s3738_s30, 0 }
  0x23   : > { %p3742_p8 = scmp.ne.s32.totalorder (!%p3741_p6), %s3739_s6, 0 }
  0x24   : > { %255 = sbr.rel (%p3741_p6) target bundleno = 940 (0x3ac), region = 48 }
  0x2b   : > { %3350 = dma.done.wait (%p3742_p8), [#allocation4], 25600  }
  0x2c   : > { %3352 = vsyncadd (%p3742_p8), [#allocation4], 4294941696  ;;  %v2903_v0 = vld [vmem:[#allocation3 + $0x4] ss:$16 sps:$4 sm:$0xff]   ;;  %v2907_v2 = vld [vmem:[#allocation3] ss:$16 sps:$4 sm:$0xff]  }
  0x2d   : > { %v2905_v1 = vld [vmem:[#allocation3 + $0x204] ss:$16 sps:$4 sm:$0xff]   ;;  %1571 = vmatprep.subr.bf16.mxu1 %v2903_v0  ;;  %v2908_v3 = vld [vmem:[#allocation3 + $0x200] ss:$16 sps:$4 sm:$0xff]   ;;  %s2561_s21 = sshll.u32 %s2554_s27, 1  ;;  %vm1567_vm0 = vcmask 261120  }
  0x2e   : > { %1614 = vmatprep.subr.bf16.mxu0 %v2905_v1  ;;  %v2909_v4 = vld [vmem:[#allocation3 + $0x24] ss:$16 sps:$4 sm:$0xff]   ;;  %1572 = vmatpush1.bf16.msra.mxu1 %v2907_v2  ;;  %v2913_v6 = vld [vmem:[#allocation3 + $0x20] ss:$16 sps:$4 sm:$0xff]   ;;  %p289_p2 = scmp.lt.s32.totalorder %s2561_s21, 3  ;;  %s2459_s29 = sld [smem:[#allocation2]] }
  0x2f   : > { %1615 = vmatpush1.bf16.msra.mxu0 %v2908_v3  ;;  %v2911_v5 = vld [vmem:[#allocation3 + $0x224] ss:$16 sps:$4 sm:$0xff]   ;;  %1573 = vmatprep.subr.bf16.mxu1 %v2909_v4  ;;  %v2914_v7 = vld [vmem:[#allocation3 + $0x220] ss:$16 sps:$4 sm:$0xff]   ;;  %v3010_v3 = vld [vmem:[#allocation3 + $0xc] ss:$16 sps:$4 sm:$0xff]  }
  0x30   : > { %1616 = vmatprep.subr.bf16.mxu0 %v2911_v5  ;;  %v2915_v8 = vld [vmem:[#allocation3 + $0x44] ss:$16 sps:$4 sm:$0xff]   ;;  %v2919_v10 = vld [vmem:[#allocation3 + $0x40] ss:$16 sps:$4 sm:$0xff]   ;;  %s3744_s21 = smov (!%p289_p2, %s2561_s21), 3  ;;  %vm2483_vm13 = vcmask 7168  }
  0x31   : > { %v2917_v9 = vld [vmem:[#allocation3 + $0x244] ss:$16 sps:$4 sm:$0xff]   ;;  %v2920_v11 = vld [vmem:[#allocation3 + $0x240] ss:$16 sps:$4 sm:$0xff]   ;;  %s2880_s22 = smul.u32 28, %s3744_s21  ;;  %s2564_s30 = sshll.u32 %s3744_s21, 3 }
  0x32   : > { %1574 = vmatpush1.bf16.msra.mxu1 %v2913_v6  ;;  %v2921_v12 = vld [vmem:[#allocation3 + $0x64] ss:$16 sps:$4 sm:$0xff]   ;;  %v2925_v14 = vld [vmem:[#allocation3 + $0x60] ss:$16 sps:$4 sm:$0xff]   ;;  %s299_s9 = scalar_lea.vmem %s3734_s7, %s2564_s30 }
  0x33   : > { %1617 = vmatpush1.bf16.msra.mxu0 %v2914_v7  ;;  %1575 = vmatprep.subr.bf16.mxu1 %v2915_v8  ;;  %v2923_v13 = vld [vmem:[#allocation3 + $0x264] ss:$16 sps:$4 sm:$0xff]   ;;  %v2926_v15 = vld [vmem:[#allocation3 + $0x260] ss:$16 sps:$4 sm:$0xff]   ;;  %s3460_s25 = scalar_lea.vmem %s3727_s0, %s2880_s22  ;;  %v3008_v7 = vld [vmem:[#allocation3 + $0x8] ss:$16 sps:$4 sm:$0xff]  }
  0x34   : > { %1618 = vmatprep.subr.bf16.mxu0 %v2917_v9  ;;  %v2927_v16 = vld [vmem:[#allocation3 + $0x84] ss:$16 sps:$4 sm:$0xff]   ;;  %v2931_v18 = vld [vmem:[#allocation3 + $0x80] ss:$16 sps:$4 sm:$0xff]   ;;  %v3464_v51 = vld [vmem:[%s3460_s25 + $0xc] ss:$28 sps:$4 sm:$0xff]  }
  0x35   : > { %v2929_v17 = vld [vmem:[#allocation3 + $0x284] ss:$16 sps:$4 sm:$0xff]   ;;  %v2932_v19 = vld [vmem:[#allocation3 + $0x280] ss:$16 sps:$4 sm:$0xff]   ;;  %1646 = vmatprep.mubr.bf16.mxu0 %v3464_v51  ;;  %v3016_v9 = vld [vmem:[#allocation3 + $0x2c] ss:$16 sps:$4 sm:$0xff]  }
  0x36   : > { %1576 = vmatpush1.bf16.msra.mxu1 %v2919_v10  ;;  %v2933_v20 = vld [vmem:[#allocation3 + $0xa4] ss:$16 sps:$4 sm:$0xff]   ;;  %v2937_v22 = vld [vmem:[#allocation3 + $0xa0] ss:$16 sps:$4 sm:$0xff]  }
  0x37   : > { %1619 = vmatpush1.bf16.msra.mxu0 %v2920_v11  ;;  %1577 = vmatprep.subr.bf16.mxu1 %v2921_v12  ;;  %v2935_v21 = vld [vmem:[#allocation3 + $0x2a4] ss:$16 sps:$4 sm:$0xff]   ;;  %v2938_v23 = vld [vmem:[#allocation3 + $0x2a0] ss:$16 sps:$4 sm:$0xff]   ;;  %v3014_v11 = vld [vmem:[#allocation3 + $0x28] ss:$16 sps:$4 sm:$0xff]  }
  0x38   : > { %1620 = vmatprep.subr.bf16.mxu0 %v2923_v13  ;;  %v2939_v24 = vld [vmem:[#allocation3 + $0xc4] ss:$16 sps:$4 sm:$0xff]   ;;  %v2943_v26 = vld [vmem:[#allocation3 + $0xc0] ss:$16 sps:$4 sm:$0xff]   ;;  %v3022_v13 = vld [vmem:[#allocation3 + $0x4c] ss:$16 sps:$4 sm:$0xff]  }
  0x39   : > { %v2941_v25 = vld [vmem:[#allocation3 + $0x2c4] ss:$16 sps:$4 sm:$0xff]   ;;  %v2944_v27 = vld [vmem:[#allocation3 + $0x2c0] ss:$16 sps:$4 sm:$0xff]  }
  0x3a   : > { %1578 = vmatpush1.bf16.msra.mxu1 %v2925_v14  ;;  %v2945_v28 = vld [vmem:[#allocation3 + $0xe4] ss:$16 sps:$4 sm:$0xff]   ;;  %v2949_v30 = vld [vmem:[#allocation3 + $0xe0] ss:$16 sps:$4 sm:$0xff]  }
  0x3b   : > { %1621 = vmatpush1.bf16.msra.mxu0 %v2926_v15  ;;  %1579 = vmatprep.subr.bf16.mxu1 %v2927_v16  ;;  %v2947_v29 = vld [vmem:[#allocation3 + $0x2e4] ss:$16 sps:$4 sm:$0xff]   ;;  %v2950_v31 = vld [vmem:[#allocation3 + $0x2e0] ss:$16 sps:$4 sm:$0xff]   ;;  %v3020_v15 = vld [vmem:[#allocation3 + $0x48] ss:$16 sps:$4 sm:$0xff]  }
  0x3c   : > { %1622 = vmatprep.subr.bf16.mxu0 %v2929_v17  ;;  %v2951_v32 = vld [vmem:[#allocation3 + $0x104] ss:$16 sps:$4 sm:$0xff]   ;;  %v2955_v34 = vld [vmem:[#allocation3 + $0x100] ss:$16 sps:$4 sm:$0xff]   ;;  %v3028_v17 = vld [vmem:[#allocation3 + $0x6c] ss:$16 sps:$4 sm:$0xff]  }
  0x3d   : > { %v2953_v33 = vld [vmem:[#allocation3 + $0x304] ss:$16 sps:$4 sm:$0xff]   ;;  %v2956_v35 = vld [vmem:[#allocation3 + $0x300] ss:$16 sps:$4 sm:$0xff]  }
  0x3e   : > { %1580 = vmatpush1.bf16.msra.mxu1 %v2931_v18  ;;  %v2957_v36 = vld [vmem:[#allocation3 + $0x124] ss:$16 sps:$4 sm:$0xff]   ;;  %v2961_v38 = vld [vmem:[#allocation3 + $0x120] ss:$16 sps:$4 sm:$0xff]  }
  0x3f   : > { %1623 = vmatpush1.bf16.msra.mxu0 %v2932_v19  ;;  %1581 = vmatprep.subr.bf16.mxu1 %v2933_v20  ;;  %v2959_v37 = vld [vmem:[#allocation3 + $0x324] ss:$16 sps:$4 sm:$0xff]   ;;  %v2962_v39 = vld [vmem:[#allocation3 + $0x320] ss:$16 sps:$4 sm:$0xff]   ;;  %v3026_v19 = vld [vmem:[#allocation3 + $0x68] ss:$16 sps:$4 sm:$0xff]  }
  0x40   : > { %1624 = vmatprep.subr.bf16.mxu0 %v2935_v21  ;;  %v2963_v40 = vld [vmem:[#allocation3 + $0x144] ss:$16 sps:$4 sm:$0xff]   ;;  %v2967_v42 = vld [vmem:[#allocation3 + $0x140] ss:$16 sps:$4 sm:$0xff]   ;;  %v3034_v21 = vld [vmem:[#allocation3 + $0x8c] ss:$16 sps:$4 sm:$0xff]  }
  0x41   : > { %v2965_v41 = vld [vmem:[#allocation3 + $0x344] ss:$16 sps:$4 sm:$0xff]   ;;  %v2968_v43 = vld [vmem:[#allocation3 + $0x340] ss:$16 sps:$4 sm:$0xff]  }
  0x42   : > { %1582 = vmatpush1.bf16.msra.mxu1 %v2937_v22  ;;  %v2969_v44 = vld [vmem:[#allocation3 + $0x164] ss:$16 sps:$4 sm:$0xff]   ;;  %v2973_v46 = vld [vmem:[#allocation3 + $0x160] ss:$16 sps:$4 sm:$0xff]  }
  0x43   : > { %1625 = vmatpush1.bf16.msra.mxu0 %v2938_v23  ;;  %1583 = vmatprep.subr.bf16.mxu1 %v2939_v24  ;;  %v2971_v45 = vld [vmem:[#allocation3 + $0x364] ss:$16 sps:$4 sm:$0xff]   ;;  %v2974_v47 = vld [vmem:[#allocation3 + $0x360] ss:$16 sps:$4 sm:$0xff]   ;;  %v3032_v23 = vld [vmem:[#allocation3 + $0x88] ss:$16 sps:$4 sm:$0xff]  }
  0x44   : > { %1626 = vmatprep.subr.bf16.mxu0 %v2941_v25  ;;  %v2975_v48 = vld [vmem:[#allocation3 + $0x184] ss:$16 sps:$4 sm:$0xff]   ;;  %v2979_v52 = vld [vmem:[#allocation3 + $0x180] ss:$16 sps:$4 sm:$0xff]   ;;  %v3040_v25 = vld [vmem:[#allocation3 + $0xac] ss:$16 sps:$4 sm:$0xff]  }
  0x45   : > { %v3001_v49 = vld [vmem:[%s3460_s25 + $0x4] ss:$28 sps:$4 sm:$0xff]  }
  0x46   : > { %1584 = vmatpush1.bf16.msra.mxu1 %v2943_v26  ;;  %v2977_v50 = vld [vmem:[#allocation3 + $0x384] ss:$16 sps:$4 sm:$0xff]   ;;  %1603 = vmatprep.mubr.bf16.mxu1 %v3001_v49  ;;  %v2980_v53 = vld [vmem:[#allocation3 + $0x380] ss:$16 sps:$4 sm:$0xff]  }
  0x47   : > { %1627 = vmatpush1.bf16.msra.mxu0 %v2944_v27  ;;  %1585 = vmatprep.subr.bf16.mxu1 %v2945_v28  ;;  %v2981_v54 = vld [vmem:[#allocation3 + $0x1a4] ss:$16 sps:$4 sm:$0xff]   ;;  %v2985_v56 = vld [vmem:[#allocation3 + $0x1a0] ss:$16 sps:$4 sm:$0xff]   ;;  %v3038_v27 = vld [vmem:[#allocation3 + $0xa8] ss:$16 sps:$4 sm:$0xff]  }
  0x48   : > { %1628 = vmatprep.subr.bf16.mxu0 %v2947_v29  ;;  %v2983_v55 = vld [vmem:[#allocation3 + $0x3a4] ss:$16 sps:$4 sm:$0xff]   ;;  %v2986_v57 = vld [vmem:[#allocation3 + $0x3a0] ss:$16 sps:$4 sm:$0xff]   ;;  %v3046_v29 = vld [vmem:[#allocation3 + $0xcc] ss:$16 sps:$4 sm:$0xff]  }
  0x49   : > { %v2987_v58 = vld [vmem:[#allocation3 + $0x1c4] ss:$16 sps:$4 sm:$0xff]   ;;  %v2991_v60 = vld [vmem:[#allocation3 + $0x1c0] ss:$16 sps:$4 sm:$0xff]  }
  0x4a   : > { %1586 = vmatpush1.bf16.msra.mxu1 %v2949_v30  ;;  %v2989_v59 = vld [vmem:[#allocation3 + $0x3c4] ss:$16 sps:$4 sm:$0xff]   ;;  %v2992_v61 = vld [vmem:[#allocation3 + $0x3c0] ss:$16 sps:$4 sm:$0xff]  }
  0x4b   : > { %1629 = vmatpush1.bf16.msra.mxu0 %v2950_v31  ;;  %1587 = vmatprep.subr.bf16.mxu1 %v2951_v32  ;;  %v2993_v62 = vld [vmem:[#allocation3 + $0x1e4] ss:$16 sps:$4 sm:$0xff]   ;;  %v2997_v0 = vld [vmem:[#allocation3 + $0x1e0] ss:$16 sps:$4 sm:$0xff]   ;;  %v3044_v31 = vld [vmem:[#allocation3 + $0xc8] ss:$16 sps:$4 sm:$0xff]  }
  0x4c   : > { %1630 = vmatprep.subr.bf16.mxu0 %v2953_v33  ;;  %v2995_v63 = vld [vmem:[#allocation3 + $0x3e4] ss:$16 sps:$4 sm:$0xff]   ;;  %v2998_v1 = vld [vmem:[#allocation3 + $0x3e0] ss:$16 sps:$4 sm:$0xff]   ;;  %v3052_v33 = vld [vmem:[#allocation3 + $0xec] ss:$16 sps:$4 sm:$0xff]  }
  0x4d   : > { %v3007_v2 = vld [vmem:[#allocation3 + $0x404] ss:$16 sps:$4 sm:$0xff]   ;;  %v3468_v4 = vld [vmem:[%s3460_s25] ss:$28 sps:$4 sm:$0xff]  }
  0x4e   : > { %1588 = vmatpush1.bf16.msra.mxu1 %v2955_v34  ;;  %v3471_v5 = vld [vmem:[%s3460_s25 + $0x8] ss:$28 sps:$4 sm:$0xff]   ;;  %v3005_v6 = vld [vmem:[#allocation3 + $0x400] ss:$16 sps:$4 sm:$0xff]  }
  0x4f   : > { %1631 = vmatpush1.bf16.msra.mxu0 %v2956_v35  ;;  %1589 = vmatprep.subr.bf16.mxu1 %v2957_v36  ;;  %v3013_v8 = vld [vmem:[#allocation3 + $0x424] ss:$16 sps:$4 sm:$0xff]   ;;  %v3011_v10 = vld [vmem:[#allocation3 + $0x420] ss:$16 sps:$4 sm:$0xff]   ;;  %v3050_v36 = vld [vmem:[#allocation3 + $0xe8] ss:$16 sps:$4 sm:$0xff]  }
  0x50   : > { %1632 = vmatprep.subr.bf16.mxu0 %v2959_v37  ;;  %v3019_v12 = vld [vmem:[#allocation3 + $0x444] ss:$16 sps:$4 sm:$0xff]   ;;  %v3017_v14 = vld [vmem:[#allocation3 + $0x440] ss:$16 sps:$4 sm:$0xff]  }
  0x51   : > { %v3025_v16 = vld [vmem:[#allocation3 + $0x464] ss:$16 sps:$4 sm:$0xff]   ;;  %v3023_v18 = vld [vmem:[#allocation3 + $0x460] ss:$16 sps:$4 sm:$0xff]  }
  0x52   : > { %1590 = vmatpush1.bf16.msra.mxu1 %v2961_v38  ;;  %v3031_v20 = vld [vmem:[#allocation3 + $0x484] ss:$16 sps:$4 sm:$0xff]   ;;  %v3029_v22 = vld [vmem:[#allocation3 + $0x480] ss:$16 sps:$4 sm:$0xff]   ;;  %v3058_v38 = vld [vmem:[#allocation3 + $0x10c] ss:$16 sps:$4 sm:$0xff]  }
  0x53   : > { %1633 = vmatpush1.bf16.msra.mxu0 %v2962_v39  ;;  %1591 = vmatprep.subr.bf16.mxu1 %v2963_v40  ;;  %v3037_v24 = vld [vmem:[#allocation3 + $0x4a4] ss:$16 sps:$4 sm:$0xff]   ;;  %v3035_v26 = vld [vmem:[#allocation3 + $0x4a0] ss:$16 sps:$4 sm:$0xff]   ;;  %v3056_v40 = vld [vmem:[#allocation3 + $0x108] ss:$16 sps:$4 sm:$0xff]  }
  0x54   : > { %1634 = vmatprep.subr.bf16.mxu0 %v2965_v41  ;;  %v3043_v28 = vld [vmem:[#allocation3 + $0x4c4] ss:$16 sps:$4 sm:$0xff]   ;;  %v3041_v30 = vld [vmem:[#allocation3 + $0x4c0] ss:$16 sps:$4 sm:$0xff]  }
  0x55   : > { %v3049_v32 = vld [vmem:[#allocation3 + $0x4e4] ss:$16 sps:$4 sm:$0xff]   ;;  %v3047_v35 = vld [vmem:[#allocation3 + $0x4e0] ss:$16 sps:$4 sm:$0xff]  }
  0x56   : > { %1592 = vmatpush1.bf16.msra.mxu1 %v2967_v42  ;;  %v3476_v34 = vld [vmem:[%s3460_s25 + $0x14] ss:$28 sps:$4 sm:$0xff]   ;;  %v3064_v42 = vld [vmem:[#allocation3 + $0x12c] ss:$16 sps:$4 sm:$0xff]  }
  0x57   : > { %1635 = vmatpush1.bf16.msra.mxu0 %v2968_v43  ;;  %1593 = vmatprep.subr.bf16.mxu1 %v2969_v44  ;;  %v3055_v37 = vld [vmem:[#allocation3 + $0x504] ss:$16 sps:$4 sm:$0xff]   ;;  %v3053_v39 = vld [vmem:[#allocation3 + $0x500] ss:$16 sps:$4 sm:$0xff]   ;;  %v3062_v44 = vld [vmem:[#allocation3 + $0x128] ss:$16 sps:$4 sm:$0xff]  }
  0x58   : > { %1636 = vmatprep.subr.bf16.mxu0 %v2971_v45  ;;  %v3061_v41 = vld [vmem:[#allocation3 + $0x524] ss:$16 sps:$4 sm:$0xff]   ;;  %v3059_v43 = vld [vmem:[#allocation3 + $0x520] ss:$16 sps:$4 sm:$0xff]  }
  0x59   : > { %v3067_v45 = vld [vmem:[#allocation3 + $0x544] ss:$16 sps:$4 sm:$0xff]  }
  0x5a   : > { %1594 = vmatpush1.bf16.msra.mxu1 %v2973_v46  ;;  %v3070_v46 = vld [vmem:[#allocation3 + $0x14c] ss:$16 sps:$4 sm:$0xff]  }
  0x5b   : > { %1637 = vmatpush1.bf16.msra.mxu0 %v2974_v47  ;;  %1595 = vmatprep.subr.bf16.mxu1 %v2975_v48  ;;  %v3065_v47 = vld [vmem:[#allocation3 + $0x540] ss:$16 sps:$4 sm:$0xff]   ;;  %v3068_v48 = vld [vmem:[#allocation3 + $0x148] ss:$16 sps:$4 sm:$0xff]  }
  0x5c   : > { %1638 = vmatprep.subr.bf16.mxu0 %v2977_v50  ;;  %v3076_v50 = vld [vmem:[#allocation3 + $0x16c] ss:$16 sps:$4 sm:$0xff]  }
  0x5e   : > { %1596 = vmatpush1.bf16.msra.mxu1 %v2979_v52  ;;  %v3071_v52 = vld [vmem:[#allocation3 + $0x560] ss:$16 sps:$4 sm:$0xff]  }
  0x5f   : > { %1639 = vmatpush1.bf16.msra.mxu0 %v2980_v53  ;;  %1597 = vmatprep.subr.bf16.mxu1 %v2981_v54  ;;  %v3074_v53 = vld [vmem:[#allocation3 + $0x168] ss:$16 sps:$4 sm:$0xff]   ;;  %v3079_v54 = vld [vmem:[#allocation3 + $0x584] ss:$16 sps:$4 sm:$0xff]  }
  0x60   : > { %1640 = vmatprep.subr.bf16.mxu0 %v2983_v55  ;;  %v3082_v55 = vld [vmem:[#allocation3 + $0x18c] ss:$16 sps:$4 sm:$0xff]  }
  0x62   : > { %1598 = vmatpush1.bf16.msra.mxu1 %v2985_v56  ;;  %v3077_v56 = vld [vmem:[#allocation3 + $0x580] ss:$16 sps:$4 sm:$0xff]  }
  0x63   : > { %1641 = vmatpush1.bf16.msra.mxu0 %v2986_v57  ;;  %1599 = vmatprep.subr.bf16.mxu1 %v2987_v58  ;;  %v3080_v57 = vld [vmem:[#allocation3 + $0x188] ss:$16 sps:$4 sm:$0xff]   ;;  %v3085_v58 = vld [vmem:[#allocation3 + $0x5a4] ss:$16 sps:$4 sm:$0xff]  }
  0x64   : > { %1642 = vmatprep.subr.bf16.mxu0 %v2989_v59  ;;  %v3088_v59 = vld [vmem:[#allocation3 + $0x1ac] ss:$16 sps:$4 sm:$0xff]  }
  0x66   : > { %1600 = vmatpush1.bf16.msra.mxu1 %v2991_v60  ;;  %v3083_v60 = vld [vmem:[#allocation3 + $0x5a0] ss:$16 sps:$4 sm:$0xff]  }
  0x67   : > { %1643 = vmatpush1.bf16.msra.mxu0 %v2992_v61  ;;  %1601 = vmatprep.subr.bf16.mxu1 %v2993_v62  ;;  %v3086_v61 = vld [vmem:[#allocation3 + $0x1a8] ss:$16 sps:$4 sm:$0xff]   ;;  %v3091_v62 = vld [vmem:[#allocation3 + $0x5c4] ss:$16 sps:$4 sm:$0xff]  }
  0x68   : > { %1644 = vmatprep.subr.bf16.mxu0 %v2995_v63  ;;  %v3094_v63 = vld [vmem:[#allocation3 + $0x1cc] ss:$16 sps:$4 sm:$0xff]  }
  0x6a   : > { %1602 = vmatpush1.bf16.msra.mxu1 %v2997_v0  ;;  %v3089_v0 = vld [vmem:[#allocation3 + $0x5c0] ss:$16 sps:$4 sm:$0xff]  }
  0x6b   : > { %1645 = vmatpush1.bf16.msra.mxu0 %v2998_v1  ;;  %1743 = vmatprep.subr.bf16.mxu1 %v3010_v3  ;;  %v3092_v1 = vld [vmem:[#allocation3 + $0x1c8] ss:$16 sps:$4 sm:$0xff]   ;;  %v3100_v3 = vld [vmem:[#allocation3 + $0x1ec] ss:$16 sps:$4 sm:$0xff]  }
  0x6c   : > { %1657 = vmatprep.subr.bf16.mxu0 %v3007_v2  ;;  %v3097_v2 = vld [vmem:[#allocation3 + $0x5e4] ss:$16 sps:$4 sm:$0xff]  }
  0x6d   : > { %1604 = vmatmul.mubr.bf16.vlgmr.msra.gmra.mrb[0].mxu1 %v3468_v4 }
  0x6e   : > { %1647 = vmatmul.mubr.bf16.vlgmr.msra.gmra.mrb[0].mxu0 %v3471_v5  ;;  %1744 = vmatpush1.bf16.msra.mxu1 %v3008_v7  ;;  %v3098_v7 = vld [vmem:[#allocation3 + $0x1e8] ss:$16 sps:$4 sm:$0xff]  }
  0x6f   : > { %1658 = vmatpush1.bf16.msra.mxu0 %v3005_v6  ;;  %1745 = vmatprep.subr.bf16.mxu1 %v3016_v9  ;;  %v3095_v6 = vld [vmem:[#allocation3 + $0x5e0] ss:$16 sps:$4 sm:$0xff]   ;;  %v3109_v9 = vld [vmem:[#allocation3 + $0x604] ss:$16 sps:$4 sm:$0xff]  }
  0x70   : > { %1659 = vmatprep.subr.bf16.mxu0 %v3013_v8  ;;  %1775 = vmatprep.mubr.bf16.mxu1 %v3001_v49  ;;  %v3073_v49 = vld [vmem:[#allocation3 + $0x564] ss:$16 sps:$4 sm:$0xff]   ;;  %v3106_v8 = vld [vmem:[#allocation3 + $0x20c] ss:$16 sps:$4 sm:$0xff]  }
  0x71   : > { %1689 = vmatprep.mubr.bf16.mxu0 %v3476_v34 }
  0x72   : > { %1746 = vmatpush1.bf16.msra.mxu1 %v3014_v11  ;;  %v3104_v11 = vld [vmem:[#allocation3 + $0x208] ss:$16 sps:$4 sm:$0xff]  }
  0x73   : > { %1660 = vmatpush1.bf16.msra.mxu0 %v3011_v10  ;;  %1747 = vmatprep.subr.bf16.mxu1 %v3022_v13  ;;  %v3480_v10 = vld [vmem:[%s3460_s25 + $0x10] ss:$28 sps:$4 sm:$0xff]  }
  0x74   : > { %1661 = vmatprep.subr.bf16.mxu0 %v3019_v12  ;;  %v3107_v12 = vld [vmem:[#allocation3 + $0x600] ss:$16 sps:$4 sm:$0xff]   ;;  %v3112_v13 = vld [vmem:[#allocation3 + $0x22c] ss:$16 sps:$4 sm:$0xff]  }
  0x76   : > { %1748 = vmatpush1.bf16.msra.mxu1 %v3020_v15  ;;  %v3110_v15 = vld [vmem:[#allocation3 + $0x228] ss:$16 sps:$4 sm:$0xff]  }
  0x77   : > { %1662 = vmatpush1.bf16.msra.mxu0 %v3017_v14  ;;  %1749 = vmatprep.subr.bf16.mxu1 %v3028_v17  ;;  %v3115_v14 = vld [vmem:[#allocation3 + $0x624] ss:$16 sps:$4 sm:$0xff]   ;;  %v3118_v17 = vld [vmem:[#allocation3 + $0x24c] ss:$16 sps:$4 sm:$0xff]  }
  0x78   : > { %1663 = vmatprep.subr.bf16.mxu0 %v3025_v16  ;;  %v3113_v16 = vld [vmem:[#allocation3 + $0x620] ss:$16 sps:$4 sm:$0xff]  }
  0x7a   : > { %1750 = vmatpush1.bf16.msra.mxu1 %v3026_v19  ;;  %v3116_v19 = vld [vmem:[#allocation3 + $0x248] ss:$16 sps:$4 sm:$0xff]  }
  0x7b   : > { %1664 = vmatpush1.bf16.msra.mxu0 %v3023_v18  ;;  %1751 = vmatprep.subr.bf16.mxu1 %v3034_v21  ;;  %v3360_v18 = vmov 0   ;;  %v3122_v21 = vld [vmem:[#allocation3 + $0x26c] ss:$16 sps:$4 sm:$0xff]  }
  0x7c   : > { %1665 = vmatprep.subr.bf16.mxu0 %v3031_v20  ;;  %v3487_v20 = vld [vmem:[%s3460_s25 + $0x18] ss:$28 sps:$4 sm:$0xff]  }
  0x7e   : > { %1752 = vmatpush1.bf16.msra.mxu1 %v3032_v23  ;;  %v3123_v23 = vld [vmem:[#allocation3 + $0x288] ss:$16 sps:$4 sm:$0xff]  }
  0x7f   : > { %1666 = vmatpush1.bf16.msra.mxu0 %v3029_v22  ;;  %1753 = vmatprep.subr.bf16.mxu1 %v3040_v25  ;;  %v3125_v22 = vld [vmem:[#allocation3 + $0x28c] ss:$16 sps:$4 sm:$0xff]  }
  0x80   : > { %1667 = vmatprep.subr.bf16.mxu0 %v3037_v24  ;;  %v3128_v24 = vld [vmem:[#allocation3 + $0x2ac] ss:$16 sps:$4 sm:$0xff]  }
  0x81   : > { %v3131_v25 = vld [vmem:[#allocation3 + $0x2cc] ss:$16 sps:$4 sm:$0xff]  }
  0x82   : > { %1754 = vmatpush1.bf16.msra.mxu1 %v3038_v27  ;;  %v3134_v27 = vld [vmem:[#allocation3 + $0x2ec] ss:$16 sps:$4 sm:$0xff]  }
  0x83   : > { %1668 = vmatpush1.bf16.msra.mxu0 %v3035_v26  ;;  %1755 = vmatprep.subr.bf16.mxu1 %v3046_v29  ;;  %v3129_v26 = vld [vmem:[#allocation3 + $0x2c8] ss:$16 sps:$4 sm:$0xff]   ;;  %v3215_v29 = vld [vmem:[%s3730_s3 + $0x4] ss:$8 sps:$4 sm:$0xff]  }
  0x84   : > { %1669 = vmatprep.subr.bf16.mxu0 %v3043_v28  ;;  %v3213_v28 = vld [vmem:[%s3730_s3] ss:$8 sps:$4 sm:$0xff]  }
  0x86   : > { %1756 = vmatpush1.bf16.msra.mxu1 %v3044_v31  ;;  %v3132_v31 = vld [vmem:[#allocation3 + $0x2e8] ss:$16 sps:$4 sm:$0xff]  }
  0x87   : > { %1670 = vmatpush1.bf16.msra.mxu0 %v3041_v30  ;;  %1757 = vmatprep.subr.bf16.mxu1 %v3052_v33  ;;  %v3218_v30 = vld [vmem:[%s3730_s3 + $0x14] ss:$8 sps:$4 sm:$0xff]   ;;  %v3216_v33 = vld [vmem:[%s3730_s3 + $0x10] ss:$8 sps:$4 sm:$0xff]  }
  0x88   : > { %1671 = vmatprep.subr.bf16.mxu0 %v3049_v32  ;;  %v3137_v32 = vld [vmem:[#allocation3 + $0x30c] ss:$16 sps:$4 sm:$0xff]  }
  0x8a   : > { %1758 = vmatpush1.bf16.msra.mxu1 %v3050_v36  ;;  %v3135_v36 = vld [vmem:[#allocation3 + $0x308] ss:$16 sps:$4 sm:$0xff]  }
  0x8b   : > { %1672 = vmatpush1.bf16.msra.mxu0 %v3047_v35  ;;  %1759 = vmatprep.subr.bf16.mxu1 %v3058_v38  ;;  %v3221_v35 = vld [vmem:[%s3730_s3 + $0x24] ss:$8 sps:$4 sm:$0xff]   ;;  %v3219_v38 = vld [vmem:[%s3730_s3 + $0x20] ss:$8 sps:$4 sm:$0xff]  }
  0x8c   : > { %1673 = vmatprep.subr.bf16.mxu0 %v3055_v37  ;;  %v3140_v37 = vld [vmem:[#allocation3 + $0x32c] ss:$16 sps:$4 sm:$0xff]  }
  0x8e   : > { %1760 = vmatpush1.bf16.msra.mxu1 %v3056_v40  ;;  %v3224_v40 = vld [vmem:[%s3730_s3 + $0x34] ss:$8 sps:$4 sm:$0xff]  }
  0x8f   : > { %1674 = vmatpush1.bf16.msra.mxu0 %v3053_v39  ;;  %1761 = vmatprep.subr.bf16.mxu1 %v3064_v42  ;;  %v3138_v39 = vld [vmem:[#allocation3 + $0x328] ss:$16 sps:$4 sm:$0xff]  }
  0x90   : > { %1675 = vmatprep.subr.bf16.mxu0 %v3061_v41  ;;  %v3143_v41 = vld [vmem:[#allocation3 + $0x34c] ss:$16 sps:$4 sm:$0xff]   ;;  %v3222_v42 = vld [vmem:[%s3730_s3 + $0x30] ss:$8 sps:$4 sm:$0xff]  }
  0x92   : > { %1762 = vmatpush1.bf16.msra.mxu1 %v3062_v44  ;;  %v3141_v44 = vld [vmem:[#allocation3 + $0x348] ss:$16 sps:$4 sm:$0xff]  }
  0x93   : > { %1676 = vmatpush1.bf16.msra.mxu0 %v3059_v43  ;;  %1763 = vmatprep.subr.bf16.mxu1 %v3070_v46  ;;  %v3227_v43 = vld [vmem:[%s3730_s3 + $0x44] ss:$8 sps:$4 sm:$0xff]   ;;  %v3225_v46 = vld [vmem:[%s3730_s3 + $0x40] ss:$8 sps:$4 sm:$0xff]  }
  0x94   : > { %1677 = vmatprep.subr.bf16.mxu0 %v3067_v45  ;;  %v3146_v45 = vld [vmem:[#allocation3 + $0x36c] ss:$16 sps:$4 sm:$0xff]  }
  0x96   : > { %1764 = vmatpush1.bf16.msra.mxu1 %v3068_v48  ;;  %v3144_v48 = vld [vmem:[#allocation3 + $0x368] ss:$16 sps:$4 sm:$0xff]  }
  0x97   : > { %1678 = vmatpush1.bf16.msra.mxu0 %v3065_v47  ;;  %1765 = vmatprep.subr.bf16.mxu1 %v3076_v50  ;;  %v3230_v47 = vld [vmem:[%s3730_s3 + $0x54] ss:$8 sps:$4 sm:$0xff]   ;;  %v3228_v50 = vld [vmem:[%s3730_s3 + $0x50] ss:$8 sps:$4 sm:$0xff]  }
  0x98   : > { %1679 = vmatprep.subr.bf16.mxu0 %v3073_v49  ;;  %v3149_v49 = vld [vmem:[#allocation3 + $0x38c] ss:$16 sps:$4 sm:$0xff]  }
  0x9a   : > { %1766 = vmatpush1.bf16.msra.mxu1 %v3074_v53  ;;  %v3147_v53 = vld [vmem:[#allocation3 + $0x388] ss:$16 sps:$4 sm:$0xff]  }
  0x9b   : > { %1680 = vmatpush1.bf16.msra.mxu0 %v3071_v52  ;;  %1767 = vmatprep.subr.bf16.mxu1 %v3082_v55  ;;  %v3233_v52 = vld [vmem:[%s3730_s3 + $0x64] ss:$8 sps:$4 sm:$0xff]   ;;  %v3231_v55 = vld [vmem:[%s3730_s3 + $0x60] ss:$8 sps:$4 sm:$0xff]  }
  0x9c   : > { %1681 = vmatprep.subr.bf16.mxu0 %v3079_v54  ;;  %v3152_v54 = vld [vmem:[#allocation3 + $0x3ac] ss:$16 sps:$4 sm:$0xff]  }
  0x9e   : > { %1768 = vmatpush1.bf16.msra.mxu1 %v3080_v57  ;;  %v3150_v57 = vld [vmem:[#allocation3 + $0x3a8] ss:$16 sps:$4 sm:$0xff]  }
  0x9f   : > { %1682 = vmatpush1.bf16.msra.mxu0 %v3077_v56  ;;  %1769 = vmatprep.subr.bf16.mxu1 %v3088_v59  ;;  %v3236_v56 = vld [vmem:[%s3730_s3 + $0x74] ss:$8 sps:$4 sm:$0xff]   ;;  %v3234_v59 = vld [vmem:[%s3730_s3 + $0x70] ss:$8 sps:$4 sm:$0xff]  }
  0xa0   : > { %1683 = vmatprep.subr.bf16.mxu0 %v3085_v58  ;;  %v3155_v58 = vld [vmem:[#allocation3 + $0x3cc] ss:$16 sps:$4 sm:$0xff]  }
  0xa2   : > { %1770 = vmatpush1.bf16.msra.mxu1 %v3086_v61  ;;  %v3153_v61 = vld [vmem:[#allocation3 + $0x3c8] ss:$16 sps:$4 sm:$0xff]  }
  0xa3   : > { %1684 = vmatpush1.bf16.msra.mxu0 %v3083_v60  ;;  %1771 = vmatprep.subr.bf16.mxu1 %v3094_v63  ;;  %v3239_v60 = vld [vmem:[%s3730_s3 + $0x84] ss:$8 sps:$4 sm:$0xff]   ;;  %v3237_v63 = vld [vmem:[%s3730_s3 + $0x80] ss:$8 sps:$4 sm:$0xff]  }
  0xa4   : > { %1685 = vmatprep.subr.bf16.mxu0 %v3091_v62  ;;  %v3158_v62 = vld [vmem:[#allocation3 + $0x3ec] ss:$16 sps:$4 sm:$0xff]  }
  0xa6   : > { %1772 = vmatpush1.bf16.msra.mxu1 %v3092_v1  ;;  %v3156_v1 = vld [vmem:[#allocation3 + $0x3e8] ss:$16 sps:$4 sm:$0xff]  }
  0xa7   : > { %1686 = vmatpush1.bf16.msra.mxu0 %v3089_v0  ;;  %1773 = vmatprep.subr.bf16.mxu1 %v3100_v3  ;;  %v3242_v0 = vld [vmem:[%s3730_s3 + $0x94] ss:$8 sps:$4 sm:$0xff]   ;;  %v3240_v3 = vld [vmem:[%s3730_s3 + $0x90] ss:$8 sps:$4 sm:$0xff]  }
  0xa8   : > { %1687 = vmatprep.subr.bf16.mxu0 %v3097_v2  ;;  %v3161_v2 = vld [vmem:[#allocation3 + $0x40c] ss:$16 sps:$4 sm:$0xff]  }
  0xaa   : > { %1774 = vmatpush1.bf16.msra.mxu1 %v3098_v7  ;;  %v3159_v7 = vld [vmem:[#allocation3 + $0x408] ss:$16 sps:$4 sm:$0xff]  }
  0xab   : > { %1688 = vmatpush1.bf16.msra.mxu0 %v3095_v6  ;;  %1786 = vmatprep.subr.bf16.mxu1 %v3106_v8  ;;  %v3245_v6 = vld [vmem:[%s3730_s3 + $0xa4] ss:$8 sps:$4 sm:$0xff]  }
  0xac   : > { %1700 = vmatprep.subr.bf16.mxu0 %v3109_v9  ;;  %v3164_v8 = vld [vmem:[#allocation3 + $0x42c] ss:$16 sps:$4 sm:$0xff]   ;;  %v3243_v9 = vld [vmem:[%s3730_s3 + $0xa0] ss:$8 sps:$4 sm:$0xff]  }
  0xad   : > { %1776 = vmatmul.mubr.bf16.vlgmr.msra.gmra.mrb[4].mxu1 %v3468_v4  ;;  %v3120_v4 = vld [vmem:[#allocation3 + $0x268] ss:$16 sps:$4 sm:$0xff]  }
  0xae   : > { %1690 = vmatmul.mubr.bf16.vlgmr.msra.gmra.mrb[0].mxu0 %v3480_v10  ;;  %1787 = vmatpush1.bf16.msra.mxu1 %v3104_v11  ;;  %v3248_v11 = vld [vmem:[%s3730_s3 + $0xb4] ss:$8 sps:$4 sm:$0xff]  }
  0xaf   : > { %1701 = vmatpush1.bf16.msra.mxu0 %v3107_v12  ;;  %1788 = vmatprep.subr.bf16.mxu1 %v3112_v13  ;;  %v3162_v12 = vld [vmem:[#allocation3 + $0x428] ss:$16 sps:$4 sm:$0xff]   ;;  %v3167_v13 = vld [vmem:[#allocation3 + $0x44c] ss:$16 sps:$4 sm:$0xff]  }
  0xb0   : > { %1702 = vmatprep.subr.bf16.mxu0 %v3115_v14  ;;  %1732 = vmatprep.mubr.bf16.mxu0 %v3360_v18  ;;  %v3246_v14 = vld [vmem:[%s3730_s3 + $0xb0] ss:$8 sps:$4 sm:$0xff]  }
  0xb1   : > { %1818 = vmatprep.mubr.bf16.mxu1 %v3464_v51  ;;  %v3126_v51 = vld [vmem:[#allocation3 + $0x2a8] ss:$16 sps:$4 sm:$0xff]  }
  0xb2   : > { %1789 = vmatpush1.bf16.msra.mxu1 %v3110_v15  ;;  %v3251_v15 = vld [vmem:[%s3730_s3 + $0xc4] ss:$8 sps:$4 sm:$0xff]  }
  0xb3   : > { %1703 = vmatpush1.bf16.msra.mxu0 %v3113_v16  ;;  %1790 = vmatprep.subr.bf16.mxu1 %v3118_v17  ;;  %v3165_v16 = vld [vmem:[#allocation3 + $0x448] ss:$16 sps:$4 sm:$0xff]  }
  0xb4   : > { %2339 = vmatprep.subr.bf16.mxu0 %v3215_v29  ;;  %v3168_v17 = vld [vmem:[#allocation3 + $0x468] ss:$16 sps:$4 sm:$0xff]   ;;  %v3188_v29 = vld [vmem:[#allocation3 + $0x52c] ss:$16 sps:$4 sm:$0xff]  }
  0xb6   : > { %1791 = vmatpush1.bf16.msra.mxu1 %v3116_v19  ;;  %v3173_v19 = vld [vmem:[#allocation3 + $0x48c] ss:$16 sps:$4 sm:$0xff]  }
  0xb7   : > { %1792 = vmatprep.subr.bf16.mxu1 %v3122_v21  ;;  %v3171_v21 = vld [vmem:[#allocation3 + $0x488] ss:$16 sps:$4 sm:$0xff]  }
  0xba   : > { %2772 = vmatmul.mubr.msk.bf16.vlgmr.msra.gmra.mrb[0].mxu0 %vm1567_vm0, %v3487_v20  ;;  %1793 = vmatpush1.bf16.msra.mxu1 %v3120_v4  ;;  %v3176_v4 = vld [vmem:[#allocation3 + $0x4ac] ss:$16 sps:$4 sm:$0xff]  }
  0xbb   : > { %1794 = vmatprep.subr.bf16.mxu1 %v3125_v22  ;;  %2340 = vmatpush1.bf16.msra.mxu0 %v3213_v28  ;;  %v3174_v22 = vld [vmem:[#allocation3 + $0x4a8] ss:$16 sps:$4 sm:$0xff]   ;;  %v3254_v28 = vld [vmem:[%s3730_s3 + $0xd4] ss:$8 sps:$4 sm:$0xff]  }
  0xbc   : > { %2341 = vmatprep.subr.bf16.mxu0 %v3218_v30  ;;  %v3252_v30 = vld [vmem:[%s3730_s3 + $0xd0] ss:$8 sps:$4 sm:$0xff]  }
  0xbe   : > { %1795 = vmatpush1.bf16.msra.mxu1 %v3123_v23  ;;  %v3179_v23 = vld [vmem:[#allocation3 + $0x4cc] ss:$16 sps:$4 sm:$0xff]  }
  0xbf   : > { %1796 = vmatprep.subr.bf16.mxu1 %v3128_v24  ;;  %2342 = vmatpush1.bf16.msra.mxu0 %v3216_v33  ;;  %v3177_v24 = vld [vmem:[#allocation3 + $0x4c8] ss:$16 sps:$4 sm:$0xff]   ;;  %v3191_v33 = vld [vmem:[#allocation3 + $0x54c] ss:$16 sps:$4 sm:$0xff]  }
  0xc0   : > { %2343 = vmatprep.subr.bf16.mxu0 %v3221_v35  ;;  %v3255_v35 = vld [vmem:[%s3730_s3 + $0xe0] ss:$8 sps:$4 sm:$0xff]  }
  0xc2   : > { %1797 = vmatpush1.bf16.msra.mxu1 %v3126_v51  ;;  %v3182_v51 = vld [vmem:[#allocation3 + $0x4ec] ss:$16 sps:$4 sm:$0xff]  }
  0xc3   : > { %1798 = vmatprep.subr.bf16.mxu1 %v3131_v25  ;;  %2344 = vmatpush1.bf16.msra.mxu0 %v3219_v38  ;;  %v3180_v25 = vld [vmem:[#allocation3 + $0x4e8] ss:$16 sps:$4 sm:$0xff]   ;;  %v3194_v38 = vld [vmem:[#allocation3 + $0x56c] ss:$16 sps:$4 sm:$0xff]  }
  0xc4   : > { %2345 = vmatprep.subr.bf16.mxu0 %v3224_v40  ;;  %v3192_v40 = vld [vmem:[#allocation3 + $0x568] ss:$16 sps:$4 sm:$0xff]  }
  0xc6   : > { %1799 = vmatpush1.bf16.msra.mxu1 %v3129_v26  ;;  %v3185_v26 = vld [vmem:[#allocation3 + $0x50c] ss:$16 sps:$4 sm:$0xff]  }
  0xc7   : > { %1800 = vmatprep.subr.bf16.mxu1 %v3134_v27  ;;  %2346 = vmatpush1.bf16.msra.mxu0 %v3222_v42  ;;  %v3183_v27 = vld [vmem:[#allocation3 + $0x508] ss:$16 sps:$4 sm:$0xff]   ;;  %v3263_v42 = vld [vmem:[%s3730_s3 + $0x104] ss:$8 sps:$4 sm:$0xff]  }
  0xc8   : > { %2347 = vmatprep.subr.bf16.mxu0 %v3227_v43  ;;  %v3195_v43 = vld [vmem:[#allocation3 + $0x588] ss:$16 sps:$4 sm:$0xff]  }
  0xca   : > { %1801 = vmatpush1.bf16.msra.mxu1 %v3132_v31  ;;  %v3186_v31 = vld [vmem:[#allocation3 + $0x528] ss:$16 sps:$4 sm:$0xff]  }
  0xcb   : > { %1802 = vmatprep.subr.bf16.mxu1 %v3137_v32  ;;  %2348 = vmatpush1.bf16.msra.mxu0 %v3225_v46  ;;  %v3257_v32 = vld [vmem:[%s3730_s3 + $0xe4] ss:$8 sps:$4 sm:$0xff]  }
  0xcc   : > { %2349 = vmatprep.subr.bf16.mxu0 %v3230_v47  ;;  %v3203_v46 = vld [vmem:[#allocation3 + $0x5cc] ss:$16 sps:$4 sm:$0xff]   ;;  %v3201_v47 = vld [vmem:[#allocation3 + $0x5c8] ss:$16 sps:$4 sm:$0xff]  }
  0xce   : > { %1803 = vmatpush1.bf16.msra.mxu1 %v3135_v36  ;;  %v3189_v36 = vld [vmem:[#allocation3 + $0x548] ss:$16 sps:$4 sm:$0xff]  }
  0xcf   : > { %1804 = vmatprep.subr.bf16.mxu1 %v3140_v37  ;;  %2350 = vmatpush1.bf16.msra.mxu0 %v3228_v50  ;;  %v3260_v37 = vld [vmem:[%s3730_s3 + $0xf4] ss:$8 sps:$4 sm:$0xff]  }
  0xd0   : > { %2351 = vmatprep.subr.bf16.mxu0 %v3233_v52  ;;  %v3209_v50 = vld [vmem:[#allocation3 + $0x60c] ss:$16 sps:$4 sm:$0xff]   ;;  %v3207_v52 = vld [vmem:[#allocation3 + $0x608] ss:$16 sps:$4 sm:$0xff]  }
  0xd2   : > { %1805 = vmatpush1.bf16.msra.mxu1 %v3138_v39  ;;  %v3258_v39 = vld [vmem:[%s3730_s3 + $0xf0] ss:$8 sps:$4 sm:$0xff]  }
  0xd3   : > { %1806 = vmatprep.subr.bf16.mxu1 %v3143_v41  ;;  %2352 = vmatpush1.bf16.msra.mxu0 %v3231_v55  ;;  %v3197_v41 = vld [vmem:[#allocation3 + $0x58c] ss:$16 sps:$4 sm:$0xff]  }
  0xd4   : > { %2353 = vmatprep.subr.bf16.mxu0 %v3236_v56 }
  0xd6   : > { %1807 = vmatpush1.bf16.msra.mxu1 %v3141_v44  ;;  %v3200_v44 = vld [vmem:[#allocation3 + $0x5ac] ss:$16 sps:$4 sm:$0xff]  }
  0xd7   : > { %1808 = vmatprep.subr.bf16.mxu1 %v3146_v45  ;;  %2354 = vmatpush1.bf16.msra.mxu0 %v3234_v59  ;;  %v3198_v45 = vld [vmem:[#allocation3 + $0x5a8] ss:$16 sps:$4 sm:$0xff]   ;;  %v512_v59 = vlaneseq }
  0xd8   : > { %2355 = vmatprep.subr.bf16.mxu0 %v3239_v60 }
  0xd9   : > { %v3596_v60 = vshrl.u32 %v512_v59, 7 }
  0xda   : > { %1809 = vmatpush1.bf16.msra.mxu1 %v3144_v48  ;;  %v3206_v48 = vld [vmem:[#allocation3 + $0x5ec] ss:$16 sps:$4 sm:$0xff]  }
  0xdb   : > { %1810 = vmatprep.subr.bf16.mxu1 %v3149_v49  ;;  %2356 = vmatpush1.bf16.msra.mxu0 %v3237_v63  ;;  %v3204_v49 = vld [vmem:[#allocation3 + $0x5e8] ss:$16 sps:$4 sm:$0xff]  }
  0xdc   : > { %2357 = vmatprep.subr.bf16.mxu0 %v3242_v0 }
  0xde   : > { %1811 = vmatpush1.bf16.msra.mxu1 %v3147_v53  ;;  %v3212_v53 = vld [vmem:[#allocation3 + $0x62c] ss:$16 sps:$4 sm:$0xff]  }
  0xdf   : > { %1812 = vmatprep.subr.bf16.mxu1 %v3152_v54  ;;  %2358 = vmatpush1.bf16.msra.mxu0 %v3240_v3  ;;  %v3210_v54 = vld [vmem:[#allocation3 + $0x628] ss:$16 sps:$4 sm:$0xff]  }
  0xe0   : > { %2359 = vmatprep.subr.bf16.mxu0 %v3245_v6 }
  0xe2   : > { %1813 = vmatpush1.bf16.msra.mxu1 %v3150_v57 }
  0xe3   : > { %1814 = vmatprep.subr.bf16.mxu1 %v3155_v58  ;;  %2360 = vmatpush1.bf16.msra.mxu0 %v3243_v9 }
  0xe4   : > { %2361 = vmatprep.subr.bf16.mxu0 %v3248_v11 }
  0xe6   : > { %1815 = vmatpush1.bf16.msra.mxu1 %v3153_v61  ;;  %v3599_v61 = vsub.s32 0, %v3596_v60 }
  0xe7   : > { %1816 = vmatprep.subr.bf16.mxu1 %v3158_v62  ;;  %2362 = vmatpush1.bf16.msra.mxu0 %v3246_v14 }
  0xe8   : > { %2363 = vmatprep.subr.bf16.mxu0 %v3251_v15 }
  0xea   : > { %1817 = vmatpush1.bf16.msra.mxu1 %v3156_v1 }
  0xeb   : > { %1829 = vmatprep.subr.bf16.mxu1 %v3161_v2 }
  0xed   : > { %1819 = vmatmul.mubr.bf16.vlgmr.msra.gmra.mrb[4].mxu1 %v3471_v5  ;;  %v3170_v5 = vld [vmem:[#allocation3 + $0x46c] ss:$16 sps:$4 sm:$0xff]  }
  0xee   : > { %1830 = vmatpush1.bf16.msra.mxu1 %v3159_v7  ;;  %1861 = vmatprep.mubr.bf16.mxu1 %v3476_v34  ;;  %v3249_v34 = vld [vmem:[%s3730_s3 + $0xc0] ss:$8 sps:$4 sm:$0xff]  }
  0xef   : > { %1831 = vmatprep.subr.bf16.mxu1 %v3164_v8  ;;  %2364 = vmatpush1.bf16.msra.mxu0 %v3249_v34 }
  0xf0   : > { %2365 = vmatprep.subr.bf16.mxu0 %v3254_v28  ;;  %v3270_v28 = vld [vmem:[%s3730_s3 + $0x130] ss:$8 sps:$4 sm:$0xff]  }
  0xf2   : > { %1832 = vmatpush1.bf16.msra.mxu1 %v3162_v12 }
  0xf3   : > { %1833 = vmatprep.subr.bf16.mxu1 %v3167_v13  ;;  %2366 = vmatpush1.bf16.msra.mxu0 %v3252_v30  ;;  %v3273_v30 = vld [vmem:[%s3730_s3 + $0x140] ss:$8 sps:$4 sm:$0xff]  }
  0xf4   : > { %2367 = vmatprep.subr.bf16.mxu0 %v3257_v32  ;;  %v3276_v32 = vld [vmem:[%s3730_s3 + $0x150] ss:$8 sps:$4 sm:$0xff]  }
  0xf6   : > { %1834 = vmatpush1.bf16.msra.mxu1 %v3165_v16 }
  0xf7   : > { %1835 = vmatprep.subr.bf16.mxu1 %v3170_v5  ;;  %2368 = vmatpush1.bf16.msra.mxu0 %v3255_v35  ;;  %v3279_v35 = vld [vmem:[%s3730_s3 + $0x160] ss:$8 sps:$4 sm:$0xff]  }
  0xf8   : > { %2369 = vmatprep.subr.bf16.mxu0 %v3260_v37  ;;  %v3282_v37 = vld [vmem:[%s3730_s3 + $0x170] ss:$8 sps:$4 sm:$0xff]  }
  0xfa   : > { %1836 = vmatpush1.bf16.msra.mxu1 %v3168_v17 }
  0xfb   : > { %1837 = vmatprep.subr.bf16.mxu1 %v3173_v19  ;;  %2370 = vmatpush1.bf16.msra.mxu0 %v3258_v39  ;;  %v3285_v39 = vld [vmem:[%s3730_s3 + $0x180] ss:$8 sps:$4 sm:$0xff]  }
  0xfc   : > { %2382 = vmatprep.subr.bf16.mxu0 %v3263_v42  ;;  %v3293_v42 = vld [vmem:[%s3730_s3 + $0x1a4] ss:$8 sps:$4 sm:$0xff]  }
  0xfe   : > { %1838 = vmatpush1.bf16.msra.mxu1 %v3171_v21 }
  0xff   : > { %1839 = vmatprep.subr.bf16.mxu1 %v3176_v4 }
 0x102   : > { %1840 = vmatpush1.bf16.msra.mxu1 %v3174_v22 }
 0x103   : > { %1841 = vmatprep.subr.bf16.mxu1 %v3179_v23  ;;  %v3261_v23 = vld [vmem:[%s3730_s3 + $0x100] ss:$8 sps:$4 sm:$0xff]  }
 0x106   : > { %1842 = vmatpush1.bf16.msra.mxu1 %v3177_v24  ;;  %v3266_v24 = vld [vmem:[%s3730_s3 + $0x114] ss:$8 sps:$4 sm:$0xff]  }
 0x107   : > { %1843 = vmatprep.subr.bf16.mxu1 %v3182_v51  ;;  %v3264_v51 = vld [vmem:[%s3730_s3 + $0x110] ss:$8 sps:$4 sm:$0xff]  }
 0x10a   : > { %1844 = vmatpush1.bf16.msra.mxu1 %v3180_v25  ;;  %v3269_v25 = vld [vmem:[%s3730_s3 + $0x124] ss:$8 sps:$4 sm:$0xff]  }
 0x10b   : > { %1845 = vmatprep.subr.bf16.mxu1 %v3185_v26  ;;  %v3267_v26 = vld [vmem:[%s3730_s3 + $0x120] ss:$8 sps:$4 sm:$0xff]  }
 0x10e   : > { %1846 = vmatpush1.bf16.msra.mxu1 %v3183_v27  ;;  %v3272_v27 = vld [vmem:[%s3730_s3 + $0x134] ss:$8 sps:$4 sm:$0xff]  }
 0x10f   : > { %1847 = vmatprep.subr.bf16.mxu1 %v3188_v29  ;;  %v3275_v29 = vld [vmem:[%s3730_s3 + $0x144] ss:$8 sps:$4 sm:$0xff]  }
 0x112   : > { %1848 = vmatpush1.bf16.msra.mxu1 %v3186_v31  ;;  %v3278_v31 = vld [vmem:[%s3730_s3 + $0x154] ss:$8 sps:$4 sm:$0xff]  }
 0x113   : > { %1849 = vmatprep.subr.bf16.mxu1 %v3191_v33  ;;  %v3281_v33 = vld [vmem:[%s3730_s3 + $0x164] ss:$8 sps:$4 sm:$0xff]  }
 0x116   : > { %1850 = vmatpush1.bf16.msra.mxu1 %v3189_v36  ;;  %v3284_v36 = vld [vmem:[%s3730_s3 + $0x174] ss:$8 sps:$4 sm:$0xff]  }
 0x117   : > { %1851 = vmatprep.subr.bf16.mxu1 %v3194_v38  ;;  %v3287_v38 = vld [vmem:[%s3730_s3 + $0x184] ss:$8 sps:$4 sm:$0xff]  }
 0x11a   : > { %1852 = vmatpush1.bf16.msra.mxu1 %v3192_v40  ;;  %v3290_v40 = vld [vmem:[%s3730_s3 + $0x194] ss:$8 sps:$4 sm:$0xff]  }
 0x11b   : > { %1853 = vmatprep.subr.bf16.mxu1 %v3197_v41  ;;  %v3288_v41 = vld [vmem:[%s3730_s3 + $0x190] ss:$8 sps:$4 sm:$0xff]  }
 0x11e   : > { %1854 = vmatpush1.bf16.msra.mxu1 %v3195_v43  ;;  %v3291_v43 = vld [vmem:[%s3730_s3 + $0x1a0] ss:$8 sps:$4 sm:$0xff]  }
 0x11f   : > { %1855 = vmatprep.subr.bf16.mxu1 %v3200_v44  ;;  %v3296_v44 = vld [vmem:[%s3730_s3 + $0x1b4] ss:$8 sps:$4 sm:$0xff]  }
 0x122   : > { %1856 = vmatpush1.bf16.msra.mxu1 %v3198_v45  ;;  %v3294_v45 = vld [vmem:[%s3730_s3 + $0x1b0] ss:$8 sps:$4 sm:$0xff]  }
 0x123   : > { %1857 = vmatprep.subr.bf16.mxu1 %v3203_v46  ;;  %v3299_v46 = vld [vmem:[%s3730_s3 + $0x1c4] ss:$8 sps:$4 sm:$0xff]  }
 0x126   : > { %1858 = vmatpush1.bf16.msra.mxu1 %v3201_v47  ;;  %v3297_v47 = vld [vmem:[%s3730_s3 + $0x1c0] ss:$8 sps:$4 sm:$0xff]  }
 0x127   : > { %1859 = vmatprep.subr.bf16.mxu1 %v3206_v48  ;;  %v3302_v48 = vld [vmem:[%s3730_s3 + $0x1d4] ss:$8 sps:$4 sm:$0xff]  }
 0x12a   : > { %1860 = vmatpush1.bf16.msra.mxu1 %v3204_v49  ;;  %v3300_v49 = vld [vmem:[%s3730_s3 + $0x1d0] ss:$8 sps:$4 sm:$0xff]  }
 0x12b   : > { %1872 = vmatprep.subr.bf16.mxu1 %v3209_v50  ;;  %v3305_v50 = vld [vmem:[%s3730_s3 + $0x1e4] ss:$8 sps:$4 sm:$0xff]  }
 0x12d   : > { %1862 = vmatmul.mubr.bf16.vlgmr.msra.gmra.mrb[4].mxu1 %v3480_v10  ;;  %v3604_v10 = vld [vmem:[%s3729_s2] sm:$0xf] }
 0x12e   : > { %1873 = vmatpush1.bf16.msra.mxu1 %v3207_v52  ;;  %1904 = vmatprep.mubr.bf16.mxu1 %v3360_v18  ;;  %v3607_v18 = vsub.s32 1, %v3596_v60  ;;  %v3303_v52 = vld [vmem:[%s3730_s3 + $0x1e0] ss:$8 sps:$4 sm:$0xff]  }
 0x12f   : > { %1874 = vmatprep.subr.bf16.mxu1 %v3212_v53  ;;  %v3308_v53 = vld [vmem:[%s3730_s3 + $0x1f4] ss:$8 sps:$4 sm:$0xff]  }
 0x130   : > { %v519_v62 = vrot.slane %v3604_v10, %v3607_v18 }
 0x132   : > { %1875 = vmatpush1.bf16.msra.mxu1 %v3210_v54  ;;  %v3306_v54 = vld [vmem:[%s3730_s3 + $0x1f0] ss:$8 sps:$4 sm:$0xff]  }
 0x139   : > { %2773 = vmatmul.mubr.msk.bf16.vlgmr.msra.gmra.mrb[4].mxu1 %vm1567_vm0, %v3487_v20  ;;  %v515_v20 = vrot.slane %v3604_v10, %v3599_v61 }
 0x140   : > { %v1605_v55 = vpop.f32.mrb[0].mxu1 }
 0x141   : > { %v1607_v56 = vpop.f32.mrb[1].mxu1  ;;  %v1606_v63 = vadd.f32 %v1605_v55, %v515_v20  ;;  %v522_v55 = vsub.s32 2, %v3596_v60 }
 0x142   : > { %v1609_v57 = vpop.f32.mrb[2].mxu1  ;;  %v1608_v0 = vadd.f32 %v1607_v56, %v519_v62  ;;  %v526_v56 = vsub.s32 3, %v3596_v60 }
 0x143   : > { %v1611_v58 = vpop.f32.mrb[3].mxu1  ;;  %v1610_v2 = vadd.f32 %v1609_v57, %v515_v20  ;;  %v523_v57 = vrot.slane %v3604_v10, %v522_v55 }
 0x144   : > { %v1612_v7 = vadd.f32 %v1611_v58, %v519_v62  ;;  %v527_v58 = vrot.slane %v3604_v10, %v526_v56 }
 0x18d   : > { %v1734_v1 = vpop.f32.mrb[0].mxu0 }
 0x18e   : > { %v2841_v3 = vadd.f32 %v1734_v1, %v1606_v63  ;;  %v1736_v6 = vpop.f32.mrb[1].mxu0 }
 0x18f   : > { %v2843_v8 = vadd.f32 %v1736_v6, %v1608_v0  ;;  %v1738_v9 = vpop.f32.mrb[2].mxu0 }
 0x190   : > { %v1923_v11 = vmul.f32 0.2, %v2841_v3  ;;  %v2845_v12 = vadd.f32 %v1738_v9, %v1610_v2  ;;  %v1740_v13 = vpop.f32.mrb[3].mxu0  ;;  %vm1915_vm1 = vcmp.ge.f32.partialorder %v2841_v3, 0.0 }
 0x191   : > { %v1924_v14 = vmul.f32 0.2, %v2843_v8  ;;  %v2847_v15 = vadd.f32 %v1740_v13, %v1612_v7  ;;  %vm1916_vm2 = vcmp.ge.f32.partialorder %v2843_v8, 0.0 }
 0x192   : > { %vm1919_vm3 = vcmp.ge.f32.partialorder %v2845_v12, 0.0  ;;  %v1927_v16 = vmul.f32 0.2, %v2845_v12  ;;  %v1931_v34 = vsel %vm1915_vm1, %v2841_v3, %v1923_v11 }
 0x193   : > { %vm1920_vm4 = vcmp.ge.f32.partialorder %v2847_v15, 0.0  ;;  %v1928_v5 = vmul.f32 0.2, %v2847_v15  ;;  %v1932_v21 = vsel %vm1916_vm2, %v2843_v8, %v1924_v14 }
 0x194   : > { %v1935_v17 = vsel %vm1919_vm3, %v2845_v12, %v1927_v16 }
 0x195   : > { %v1939_v19 = vpack.c.bf16 %v1935_v17, %v1931_v34  ;;  %v1936_v4 = vsel %vm1920_vm4, %v2847_v15, %v1928_v5  ;;  %v2007_v15 = vld [vmem:[%s3731_s4] sm:$0x3] }
 0x196   : > { %v1940_v22 = vpack.c.bf16 %v1936_v4, %v1932_v21  ;;  %v2012_v16 = vrot.slane %v2007_v15, %v3599_v61  ;;  %v2016_v5 = vrot.slane %v2007_v15, %v3607_v18  ;;  %v2437_v34 = vld [vmem:[%s3732_s5] sm:$0x3] }
 0x198   : > { %2371 = vmatprep.mubr.bf16.mxu0 %v1940_v22 }
 0x199   : > { %2372 = vmatmul.mubr.bf16.vlgmr.msra.gmra.mrb[4].mxu0 %v1939_v19 }
 0x19a   : > { %2383 = vmatpush1.bf16.msra.mxu0 %v3261_v23  ;;  %v2442_v23 = vrot.slane %v2437_v34, %v3599_v61 }
 0x19b   : > { %2384 = vmatprep.subr.bf16.mxu0 %v3266_v24 }
 0x19e   : > { %2385 = vmatpush1.bf16.msra.mxu0 %v3264_v51 }
 0x19f   : > { %2386 = vmatprep.subr.bf16.mxu0 %v3269_v25 }
 0x1a2   : > { %2387 = vmatpush1.bf16.msra.mxu0 %v3267_v26  ;;  %v2446_v26 = vrot.slane %v2437_v34, %v3607_v18  ;;  %v2460_v18 = vstv %s2459_s29 }
 0x1a3   : > { %2388 = vmatprep.subr.bf16.mxu0 %v3272_v27 }
 0x1a6   : > { %2389 = vmatpush1.bf16.msra.mxu0 %v3270_v28 }
 0x1a7   : > { %2390 = vmatprep.subr.bf16.mxu0 %v3275_v29 }
 0x1aa   : > { %2391 = vmatpush1.bf16.msra.mxu0 %v3273_v30 }
 0x1ab   : > { %2392 = vmatprep.subr.bf16.mxu0 %v3278_v31 }
 0x1ae   : > { %2393 = vmatpush1.bf16.msra.mxu0 %v3276_v32 }
 0x1af   : > { %2394 = vmatprep.subr.bf16.mxu0 %v3281_v33 }
 0x1b2   : > { %2395 = vmatpush1.bf16.msra.mxu0 %v3279_v35 }
 0x1b3   : > { %2396 = vmatprep.subr.bf16.mxu0 %v3284_v36 }
 0x1b6   : > { %2397 = vmatpush1.bf16.msra.mxu0 %v3282_v37 }
 0x1b7   : > { %2398 = vmatprep.subr.bf16.mxu0 %v3287_v38 }
 0x1ba   : > { %2399 = vmatpush1.bf16.msra.mxu0 %v3285_v39 }
 0x1bb   : > { %2400 = vmatprep.subr.bf16.mxu0 %v3290_v40 }
 0x1be   : > { %2401 = vmatpush1.bf16.msra.mxu0 %v3288_v41 }
 0x1bf   : > { %2402 = vmatprep.subr.bf16.mxu0 %v3293_v42 }
 0x1c2   : > { %2403 = vmatpush1.bf16.msra.mxu0 %v3291_v43 }
 0x1c3   : > { %2404 = vmatprep.subr.bf16.mxu0 %v3296_v44 }
 0x1c6   : > { %2405 = vmatpush1.bf16.msra.mxu0 %v3294_v45 }
 0x1c7   : > { %2406 = vmatprep.subr.bf16.mxu0 %v3299_v46 }
 0x1ca   : > { %2407 = vmatpush1.bf16.msra.mxu0 %v3297_v47 }
 0x1cb   : > { %2408 = vmatprep.subr.bf16.mxu0 %v3302_v48 }
 0x1ce   : > { %2409 = vmatpush1.bf16.msra.mxu0 %v3300_v49 }
 0x1cf   : > { %2410 = vmatprep.subr.bf16.mxu0 %v3305_v50 }
 0x1d2   : > { %2411 = vmatpush1.bf16.msra.mxu0 %v3303_v52 }
 0x1d3   : > { %2412 = vmatprep.subr.bf16.mxu0 %v3308_v53 }
 0x1d6   : > { %2413 = vmatpush1.bf16.msra.mxu0 %v3306_v54 }
 0x20c   : > { %v1906_v59 = vpop.f32.mrb[4].mxu1 }
 0x20d   : > { %v2848_v20 = vadd.f32 %v1906_v59, %v523_v57  ;;  %v1908_v62 = vpop.f32.mrb[5].mxu1 }
 0x20e   : > { %v2849_v63 = vadd.f32 %v1908_v62, %v527_v58  ;;  %v1910_v0 = vpop.f32.mrb[6].mxu1 }
 0x20f   : > { %v1925_v1 = vmul.f32 0.2, %v2848_v20  ;;  %v2850_v2 = vadd.f32 %v1910_v0, %v523_v57  ;;  %v1912_v3 = vpop.f32.mrb[7].mxu1  ;;  %vm1917_vm5 = vcmp.ge.f32.partialorder %v2848_v20, 0.0 }
 0x210   : > { %v1926_v6 = vmul.f32 0.2, %v2849_v63  ;;  %v2851_v7 = vadd.f32 %v1912_v3, %v527_v58  ;;  %vm1918_vm6 = vcmp.ge.f32.partialorder %v2849_v63, 0.0 }
 0x211   : > { %vm1921_vm7 = vcmp.ge.f32.partialorder %v2850_v2, 0.0  ;;  %v1929_v8 = vmul.f32 0.2, %v2850_v2  ;;  %v1933_v9 = vsel %vm1917_vm5, %v2848_v20, %v1925_v1 }
 0x212   : > { %vm1922_vm8 = vcmp.ge.f32.partialorder %v2851_v7, 0.0  ;;  %v1930_v60 = vmul.f32 0.2, %v2851_v7  ;;  %v1934_v10 = vsel %vm1918_vm6, %v2849_v63, %v1926_v6 }
 0x213   : > { %v1937_v11 = vsel %vm1921_vm7, %v2850_v2, %v1929_v8 }
 0x214   : > { %v1941_v12 = vpack.c.bf16 %v1937_v11, %v1933_v9  ;;  %v1938_v13 = vsel %vm1922_vm8, %v2851_v7, %v1930_v60 }
 0x215   : > { %v1942_v14 = vpack.c.bf16 %v1938_v13, %v1934_v10 }
 0x217   : > { %2414 = vmatprep.mubr.bf16.mxu0 %v1942_v14 }
 0x218   : > { %2415 = vmatmul.mubr.bf16.vlgmr.msra.gmra.mrb[4].mxu0 %v1941_v12 }
 0x2eb   : > { %v2416_v17 = vpop.f32.mrb[4].mxu0 }
 0x2ec   : > { %v2852_v19 = vadd.f32 %v2416_v17, %v2012_v16  ;;  %v2418_v21 = vpop.f32.mrb[5].mxu0 }
 0x2ed   : > { %v2853_v4 = vadd.f32 %v2418_v21, %v2016_v5  ;;  %v2420_v22 = vpop.f32.mrb[6].mxu0 }
 0x2ee   : > { %vm2425_vm9 = vcmp.ge.f32.partialorder %v2852_v19, 0.0  ;;  %v2429_v24 = vmul.f32 0.2, %v2852_v19  ;;  %v2854_v51 = vadd.f32 %v2420_v22, %v2012_v16  ;;  %v2422_v25 = vpop.f32.mrb[7].mxu0 }
 0x2ef   : > { %vm2426_vm10 = vcmp.ge.f32.partialorder %v2853_v4, 0.0  ;;  %v2430_v27 = vmul.f32 0.2, %v2853_v4  ;;  %v2855_v28 = vadd.f32 %v2422_v25, %v2016_v5 }
 0x2f0   : > { %vm2427_vm11 = vcmp.ge.f32.partialorder %v2854_v51, 0.0  ;;  %v2431_v29 = vmul.f32 0.2, %v2854_v51  ;;  %v2433_v30 = vsel %vm2425_vm9, %v2852_v19, %v2429_v24 }
 0x2f1   : > { %vm2428_vm12 = vcmp.ge.f32.partialorder %v2855_v28, 0.0  ;;  %v2432_v31 = vmul.f32 0.2, %v2855_v28  ;;  %v2434_v32 = vsel %vm2426_vm10, %v2853_v4, %v2430_v27  ;;  %v2449_v33 = vmul.f32 %v2442_v23, %v2433_v30 }
 0x2f2   : > { %v2450_v35 = vmul.f32 %v2446_v26, %v2434_v32  ;;  %v2435_v36 = vsel %vm2427_vm11, %v2854_v51, %v2431_v29 }
 0x2f3   : > { %v2436_v37 = vsel %vm2428_vm12, %v2855_v28, %v2432_v31  ;;  %v2451_v61 = vmul.f32 %v2442_v23, %v2435_v36 }
 0x2f4   : > { %v2453_v38 = vadd.f32 %v2450_v35, %v2449_v33  ;;  %v2452_v39 = vmul.f32 %v2446_v26, %v2436_v37 }
 0x2f6   : > { %2454 = vadd.xlane.f32.xlu0 %v2453_v38  ;;  %v2456_v40 = vadd.f32 %v2452_v39, %v2451_v61 }
 0x2fa   : > { %2457 = vadd.xlane.f32.xlu0 %v2456_v40 }
 0x383   : > { %v2455_v41 = vpop.xlane.xlu0 %2454 }
 0x384   : > { %v2461_v42 = vadd.f32 %v2460_v18, %v2455_v41 }
 0x386   : > { %v2463_v43 = vand.u32 2147483647, %v2461_v42  ;;  %vm2477_vm14 = vcmp.ge.f32.partialorder %v2461_v42, 0.0 }
 0x387   : > { %v2458_v44 = vpop.xlane.xlu0 %2457 }
 0x388   : > { %v2465_v45 = vsub.f32 0.0, %v2463_v43  ;;  %v2462_v46 = vadd.f32 %v2460_v18, %v2458_v44 }
 0x38a   : > { %v2467_v47 = vmul.f32 1.442695, %v2465_v45  ;;  %v2464_v48 = vand.u32 2147483647, %v2462_v46  ;;  %vm2478_vm15 = vcmp.ge.f32.partialorder %v2462_v46, 0.0 }
 0x38c   : > { %3309 = vpow2.f32 %v2467_v47  ;;  %v2466_v49 = vsub.f32 0.0, %v2464_v48 }
 0x38e   : > { %v2469_v50 = vmul.f32 1.442695, %v2466_v49 }
 0x390   : > { %3311 = vpow2.f32 %v2469_v50 }
 0x396   : > { %v3310_v52 = vpop.eup %3309 }
 0x397   : > { %v2471_v53 = vadd.f32 1.0, %v3310_v52 }
 0x399   : > { %3313 = vrcp.f32 %v2471_v53 }
 0x39a   : > { %v3312_v54 = vpop.eup %3311 }
 0x39b   : > { %v2472_v55 = vadd.f32 1.0, %v3312_v54 }
 0x39d   : > { %3315 = vrcp.f32 %v2472_v55 }
 0x3a3   : > { %v3314_v56 = vpop.eup %3313 }
 0x3a4   : > { %v2479_v57 = vmul.f32 %v3314_v56, %v3310_v52 }
 0x3a6   : > { %v2481_v58 = vsel %vm2477_vm14, %v3314_v56, %v2479_v57 }
 0x3a7   : > { %v3316_v59 = vpop.eup %3315  ;;  %2484 = vst.msk [vmem:[%s299_s9] sm:$0xff] %vm2483_vm13, %v2481_v58 }
 0x3a8   : > { %v2480_v20 = vmul.f32 %v3316_v59, %v3312_v54 }
 0x3aa   : > { %v2482_v62 = vsel %vm2478_vm15, %v3316_v59, %v2480_v20 }
 0x3ab   : > { %2485 = vst.msk [vmem:[%s299_s9 + $0x8] sm:$0xff] %vm2483_vm13, %v2482_v62 }
 0x3ac PF: > { %s19_s26 = sadd.s32 1, %s3355_s26  }
 0x3ad   : > { %p16_p3 = scmp.ge.s32.totalorder %s19_s26, 4  }
 0x3af   :  { %18 = sbr.rel (!%p16_p3) target bundleno = 3 (0x3), region = 83 }
 0x3b6   :  { %2508 = vsyncpa [#allocation4], 1 }
 0x3b7   :  { %2510 = vsyncpa [#allocation4 + $0x1], 1 }

</bundles_post_ra>
